<compile_context>
chip_gen: v5e
topology: v5e:2x2
jax: 0.10.0
libtpu: 0.0.40
codegen_flags: <defaults>
</compile_context>

<pallas_src>
import jax
import jax.numpy as jnp
from jax.experimental import pallas as pl
from jax.experimental.pallas import tpu as pltpu

LANE = 128          # padded feature width used for every layer
SLAB = 144          # per-layer slab rows: 128 weight rows + 16 bias/pad rows (bf16 tile aligned)
N_LAYERS = 5
NEG_MASK = -1e30    # logit value for padded output lanes -> softmax prob ~0


def _mlp_softmax_kernel(x_ref, p_ref, o_ref):
    """x_ref: (TB, 128) bf16,  p_ref: (5, 144, 128) bf16,  o_ref: (TB, 128) f32."""
    h = x_ref[...]                                   # bf16 activations, padded lanes are 0
    logits = None
    for k in range(N_LAYERS):
        w = p_ref[k, :LANE, :]                       # (128, 128) bf16, tile-aligned static slice
        # Bias row lives at slab row 128; rows 129..143 are zeros, so a sublane-sum over the
        # tile-aligned 16-row block recovers the (1, 128) bias without a single-row bf16 slice.
        b = jnp.sum(p_ref[k, LANE:, :].astype(jnp.float32), axis=0, keepdims=True)
        acc = jnp.dot(h, w, preferred_element_type=jnp.float32) + b   # f32 accumulation
        if k < N_LAYERS - 1:
            h = jnp.maximum(acc, 0.0).astype(jnp.bfloat16)            # bf16 between layers
        else:
            logits = acc                              # f32; padded lanes ~= -1e30

    # Numerically stable softmax over the (padded) feature axis, in f32.
    m = jnp.max(logits, axis=-1, keepdims=True)
    e = jnp.exp(logits - m)                           # padded lanes -> exp(-huge) = 0
    denom = jnp.sum(e, axis=-1, keepdims=True)
    o_ref[...] = (e * pl.reciprocal(denom, approx=True)).astype(o_ref.dtype)


def _round_up(n, m):
    return ((n + m - 1) // m) * m


def pack_params(params):
    """Pack [(W, b)] * 5 (W: (fan_in, fan_out), b: (1, fan_out)) into (5, 144, 128) bf16."""
    assert len(params) == N_LAYERS
    slabs = []
    for k, (w, b) in enumerate(params):
        fan_in, fan_out = w.shape
        w_pad = jnp.zeros((LANE, LANE), jnp.float32).at[:fan_in, :fan_out].set(
            w.astype(jnp.float32))
        fill = NEG_MASK if k == N_LAYERS - 1 else 0.0
        b_row = jnp.full((LANE,), fill, jnp.float32).at[:fan_out].set(
            b.reshape(-1).astype(jnp.float32))
        b_pad = jnp.zeros((SLAB - LANE, LANE), jnp.float32).at[0, :].set(b_row)
        slabs.append(jnp.concatenate([w_pad, b_pad], axis=0))
    return jnp.stack(slabs, axis=0).astype(jnp.bfloat16)


def binary_model_label_nn_probability(x, params):
    """x: (B, in_dim) f32.  params: list of 5 (W, b) with W: (in, out), b: (1, out)."""
    B, in_dim = x.shape
    out_dim = params[-1][0].shape[1]
    packed = pack_params(params)

    # Batch tile: multiple of 16 (bf16 sublane pair); cap keeps per-step VMEM tiny on all
    # generations (v7x 64 MiB included) while filling the MXU M dimension at large batch.
    TB = min(512, _round_up(B, 16))
    Bp = _round_up(B, TB)

    # Pad batch to a TB multiple and features to 128 lanes (zeros), cast to bf16.
    x_pad = jnp.zeros((Bp, LANE), jnp.bfloat16).at[:B, :in_dim].set(x.astype(jnp.bfloat16))

    out_padded = pl.pallas_call(
        _mlp_softmax_kernel,
        out_shape=jax.ShapeDtypeStruct((Bp, LANE), jnp.float32),
        grid=(Bp // TB,),
        in_specs=[
            pl.BlockSpec((TB, LANE), lambda i: (i, 0)),                  # x: streamed per tile
            pl.BlockSpec((N_LAYERS, SLAB, LANE), lambda i: (0, 0, 0)),   # params: VMEM-resident
        ],
        out_specs=pl.BlockSpec((TB, LANE), lambda i: (i, 0)),            # lane-dense output
        compiler_params=pltpu.CompilerParams(dimension_semantics=("parallel",)),
    )(x_pad, packed)

    return out_padded[:B, :out_dim]


def init_params(key, in_dim, h1_dim, h2_dim, h3_dim, h4_dim, out_dim):
    """Deterministic PyTorch-Linear-style uniform init."""
    dims = [(in_dim, h1_dim), (h1_dim, h2_dim), (h2_dim, h3_dim),
            (h3_dim, h4_dim), (h4_dim, out_dim)]
    params = []
    for i, (fan_in, fan_out) in enumerate(dims):
        kw, kb = jax.random.split(jax.random.fold_in(key, i))
        bound = 1.0 / jnp.sqrt(jnp.float32(fan_in))
        W = jax.random.uniform(kw, (fan_in, fan_out), jnp.float32, -bound, bound)
        b = jax.random.uniform(kb, (1, fan_out), jnp.float32, -bound, bound)
        params.append((W, b))
    return params


def _reference(x, params):
    h = x
    for k, (w, b) in enumerate(params):
        h = h @ w + b
        if k < len(params) - 1:
            h = jnp.maximum(h, 0.0)
    return jax.nn.softmax(h, axis=1)


if __name__ == "__main__":
    key = jax.random.PRNGKey(0)

    batch = 8
    in_dim, h1_dim, h2_dim, h3_dim, h4_dim, out_dim = 32, 64, 64, 32, 32, 2

    kx, kp = jax.random.split(key)
    x = jax.random.normal(kx, (batch, in_dim), jnp.float32)
    params = init_params(kp, in_dim, h1_dim, h2_dim, h3_dim, h4_dim, out_dim)

    out = binary_model_label_nn_probability(x, params)
    out = jax.block_until_ready(out)

    # sanity: shape, rows ~sum to 1 (approx reciprocal), close to f32 reference (bf16 matmuls)
    assert out.shape == (batch, out_dim)
    assert bool(jnp.all(jnp.abs(jnp.sum(out, axis=1) - 1.0) < 1e-2))
    ref = _reference(x, params)
    assert bool(jnp.max(jnp.abs(out - ref)) < 5e-2)

    print("KERNEL_OK")
</pallas_src>

<mosaic_0001>
module attributes {stable_mosaic.version = 11 : i64} {
  func.func @_mlp_softmax_kernel(%arg0: i32, %arg1: memref<16x128xbf16, #tpu.memory_space<vmem>>, %arg2: memref<5x144x128xbf16, #tpu.memory_space<vmem>>, %arg3: memref<16x128xf32, #tpu.memory_space<vmem>>) attributes {dimension_semantics = [#tpu.dimension_semantics<parallel>], iteration_bounds = array<i64: 1>, scalar_prefetch = 0 : i64, scratch_operands = 0 : i64, tpu.core_type = #tpu.core_type<tc>, window_params = [{transform_indices = @transform_0, window_bounds = array<i64: 16, 128>}, {pipeline_mode = #tpu.pipeline_mode<synchronous>, transform_indices = @transform_1, window_bounds = array<i64: 5, 144, 128>}, {transform_indices = @transform_2, window_bounds = array<i64: 16, 128>}]} {
    %c0 = arith.constant 0 : index
    %c0_0 = arith.constant 0 : index
    %0 = vector.load %arg1[%c0, %c0_0] : memref<16x128xbf16, #tpu.memory_space<vmem>>, vector<16x128xbf16>
    %c0_1 = arith.constant 0 : index
    %c0_2 = arith.constant 0 : index
    %c0_3 = arith.constant 0 : index
    %1 = vector.load %arg2[%c0_1, %c0_2, %c0_3] : memref<5x144x128xbf16, #tpu.memory_space<vmem>>, vector<1x128x128xbf16>
    %2 = vector.shape_cast %1 : vector<1x128x128xbf16> to vector<128x128xbf16>
    %c0_4 = arith.constant 0 : index
    %c128 = arith.constant 128 : index
    %c0_5 = arith.constant 0 : index
    %3 = vector.load %arg2[%c0_4, %c128, %c0_5] : memref<5x144x128xbf16, #tpu.memory_space<vmem>>, vector<1x16x128xbf16>
    %4 = vector.shape_cast %3 : vector<1x16x128xbf16> to vector<16x128xbf16>
    %5 = arith.extf %4 : vector<16x128xbf16> to vector<16x128xf32>
    %cst = arith.constant dense<0.000000e+00> : vector<128xf32>
    %6 = vector.multi_reduction <add>, %5, %cst [0] : vector<16x128xf32> to vector<128xf32>
    %7 = vector.shape_cast %6 : vector<128xf32> to vector<1x128xf32>
    %cst_6 = arith.constant dense<0.000000e+00> : vector<16x128xf32>
    %8 = tpu.matmul %0, %2, %cst_6 {dimension_numbers = #tpu.dot_dimension_numbers<[1], [0], [0], [1], [0, 0, 1, 1], [], []>} : vector<16x128xbf16>, vector<128x128xbf16>, vector<16x128xf32> -> vector<16x128xf32>
    %9 = vector.broadcast %7 : vector<1x128xf32> to vector<16x128xf32>
    %10 = arith.addf %8, %9 : vector<16x128xf32>
    %cst_7 = arith.constant 0.000000e+00 : f32
    %11 = vector.broadcast %cst_7 : f32 to vector<16x128xf32>
    %12 = arith.maximumf %10, %11 : vector<16x128xf32>
    %13 = arith.truncf %12 : vector<16x128xf32> to vector<16x128xbf16>
    %c1 = arith.constant 1 : index
    %c0_8 = arith.constant 0 : index
    %c0_9 = arith.constant 0 : index
    %14 = vector.load %arg2[%c1, %c0_8, %c0_9] : memref<5x144x128xbf16, #tpu.memory_space<vmem>>, vector<1x128x128xbf16>
    %15 = vector.shape_cast %14 : vector<1x128x128xbf16> to vector<128x128xbf16>
    %c1_10 = arith.constant 1 : index
    %c128_11 = arith.constant 128 : index
    %c0_12 = arith.constant 0 : index
    %16 = vector.load %arg2[%c1_10, %c128_11, %c0_12] : memref<5x144x128xbf16, #tpu.memory_space<vmem>>, vector<1x16x128xbf16>
    %17 = vector.shape_cast %16 : vector<1x16x128xbf16> to vector<16x128xbf16>
    %18 = arith.extf %17 : vector<16x128xbf16> to vector<16x128xf32>
    %cst_13 = arith.constant dense<0.000000e+00> : vector<128xf32>
    %19 = vector.multi_reduction <add>, %18, %cst_13 [0] : vector<16x128xf32> to vector<128xf32>
    %20 = vector.shape_cast %19 : vector<128xf32> to vector<1x128xf32>
    %cst_14 = arith.constant dense<0.000000e+00> : vector<16x128xf32>
    %21 = tpu.matmul %13, %15, %cst_14 {dimension_numbers = #tpu.dot_dimension_numbers<[1], [0], [0], [1], [0, 0, 1, 1], [], []>} : vector<16x128xbf16>, vector<128x128xbf16>, vector<16x128xf32> -> vector<16x128xf32>
    %22 = vector.broadcast %20 : vector<1x128xf32> to vector<16x128xf32>
    %23 = arith.addf %21, %22 : vector<16x128xf32>
    %cst_15 = arith.constant 0.000000e+00 : f32
    %24 = vector.broadcast %cst_15 : f32 to vector<16x128xf32>
    %25 = arith.maximumf %23, %24 : vector<16x128xf32>
    %26 = arith.truncf %25 : vector<16x128xf32> to vector<16x128xbf16>
    %c2 = arith.constant 2 : index
    %c0_16 = arith.constant 0 : index
    %c0_17 = arith.constant 0 : index
    %27 = vector.load %arg2[%c2, %c0_16, %c0_17] : memref<5x144x128xbf16, #tpu.memory_space<vmem>>, vector<1x128x128xbf16>
    %28 = vector.shape_cast %27 : vector<1x128x128xbf16> to vector<128x128xbf16>
    %c2_18 = arith.constant 2 : index
    %c128_19 = arith.constant 128 : index
    %c0_20 = arith.constant 0 : index
    %29 = vector.load %arg2[%c2_18, %c128_19, %c0_20] : memref<5x144x128xbf16, #tpu.memory_space<vmem>>, vector<1x16x128xbf16>
    %30 = vector.shape_cast %29 : vector<1x16x128xbf16> to vector<16x128xbf16>
    %31 = arith.extf %30 : vector<16x128xbf16> to vector<16x128xf32>
    %cst_21 = arith.constant dense<0.000000e+00> : vector<128xf32>
    %32 = vector.multi_reduction <add>, %31, %cst_21 [0] : vector<16x128xf32> to vector<128xf32>
    %33 = vector.shape_cast %32 : vector<128xf32> to vector<1x128xf32>
    %cst_22 = arith.constant dense<0.000000e+00> : vector<16x128xf32>
    %34 = tpu.matmul %26, %28, %cst_22 {dimension_numbers = #tpu.dot_dimension_numbers<[1], [0], [0], [1], [0, 0, 1, 1], [], []>} : vector<16x128xbf16>, vector<128x128xbf16>, vector<16x128xf32> -> vector<16x128xf32>
    %35 = vector.broadcast %33 : vector<1x128xf32> to vector<16x128xf32>
    %36 = arith.addf %34, %35 : vector<16x128xf32>
    %cst_23 = arith.constant 0.000000e+00 : f32
    %37 = vector.broadcast %cst_23 : f32 to vector<16x128xf32>
    %38 = arith.maximumf %36, %37 : vector<16x128xf32>
    %39 = arith.truncf %38 : vector<16x128xf32> to vector<16x128xbf16>
    %c3 = arith.constant 3 : index
    %c0_24 = arith.constant 0 : index
    %c0_25 = arith.constant 0 : index
    %40 = vector.load %arg2[%c3, %c0_24, %c0_25] : memref<5x144x128xbf16, #tpu.memory_space<vmem>>, vector<1x128x128xbf16>
    %41 = vector.shape_cast %40 : vector<1x128x128xbf16> to vector<128x128xbf16>
    %c3_26 = arith.constant 3 : index
    %c128_27 = arith.constant 128 : index
    %c0_28 = arith.constant 0 : index
    %42 = vector.load %arg2[%c3_26, %c128_27, %c0_28] : memref<5x144x128xbf16, #tpu.memory_space<vmem>>, vector<1x16x128xbf16>
    %43 = vector.shape_cast %42 : vector<1x16x128xbf16> to vector<16x128xbf16>
    %44 = arith.extf %43 : vector<16x128xbf16> to vector<16x128xf32>
    %cst_29 = arith.constant dense<0.000000e+00> : vector<128xf32>
    %45 = vector.multi_reduction <add>, %44, %cst_29 [0] : vector<16x128xf32> to vector<128xf32>
    %46 = vector.shape_cast %45 : vector<128xf32> to vector<1x128xf32>
    %cst_30 = arith.constant dense<0.000000e+00> : vector<16x128xf32>
    %47 = tpu.matmul %39, %41, %cst_30 {dimension_numbers = #tpu.dot_dimension_numbers<[1], [0], [0], [1], [0, 0, 1, 1], [], []>} : vector<16x128xbf16>, vector<128x128xbf16>, vector<16x128xf32> -> vector<16x128xf32>
    %48 = vector.broadcast %46 : vector<1x128xf32> to vector<16x128xf32>
    %49 = arith.addf %47, %48 : vector<16x128xf32>
    %cst_31 = arith.constant 0.000000e+00 : f32
    %50 = vector.broadcast %cst_31 : f32 to vector<16x128xf32>
    %51 = arith.maximumf %49, %50 : vector<16x128xf32>
    %52 = arith.truncf %51 : vector<16x128xf32> to vector<16x128xbf16>
    %c4 = arith.constant 4 : index
    %c0_32 = arith.constant 0 : index
    %c0_33 = arith.constant 0 : index
    %53 = vector.load %arg2[%c4, %c0_32, %c0_33] : memref<5x144x128xbf16, #tpu.memory_space<vmem>>, vector<1x128x128xbf16>
    %54 = vector.shape_cast %53 : vector<1x128x128xbf16> to vector<128x128xbf16>
    %c4_34 = arith.constant 4 : index
    %c128_35 = arith.constant 128 : index
    %c0_36 = arith.constant 0 : index
    %55 = vector.load %arg2[%c4_34, %c128_35, %c0_36] : memref<5x144x128xbf16, #tpu.memory_space<vmem>>, vector<1x16x128xbf16>
    %56 = vector.shape_cast %55 : vector<1x16x128xbf16> to vector<16x128xbf16>
    %57 = arith.extf %56 : vector<16x128xbf16> to vector<16x128xf32>
    %cst_37 = arith.constant dense<0.000000e+00> : vector<128xf32>
    %58 = vector.multi_reduction <add>, %57, %cst_37 [0] : vector<16x128xf32> to vector<128xf32>
    %59 = vector.shape_cast %58 : vector<128xf32> to vector<1x128xf32>
    %cst_38 = arith.constant dense<0.000000e+00> : vector<16x128xf32>
    %60 = tpu.matmul %52, %54, %cst_38 {dimension_numbers = #tpu.dot_dimension_numbers<[1], [0], [0], [1], [0, 0, 1, 1], [], []>} : vector<16x128xbf16>, vector<128x128xbf16>, vector<16x128xf32> -> vector<16x128xf32>
    %61 = vector.broadcast %59 : vector<1x128xf32> to vector<16x128xf32>
    %62 = arith.addf %60, %61 : vector<16x128xf32>
    %cst_39 = arith.constant dense<0xFF800000> : vector<16xf32>
    %63 = vector.multi_reduction <maximumf>, %62, %cst_39 [1] : vector<16x128xf32> to vector<16xf32>
    %64 = vector.shape_cast %63 : vector<16xf32> to vector<16x1xf32>
    %65 = vector.broadcast %64 : vector<16x1xf32> to vector<16x128xf32>
    %66 = arith.subf %62, %65 : vector<16x128xf32>
    %67 = math.exp %66 : vector<16x128xf32>
    %cst_40 = arith.constant dense<0.000000e+00> : vector<16xf32>
    %68 = vector.multi_reduction <add>, %67, %cst_40 [1] : vector<16x128xf32> to vector<16xf32>
    %69 = vector.shape_cast %68 : vector<16xf32> to vector<16x1xf32>
    %70 = tpu.reciprocal %69 {approx = true} : vector<16x1xf32> -> vector<16x1xf32>
    %71 = vector.broadcast %70 : vector<16x1xf32> to vector<16x128xf32>
    %72 = arith.mulf %67, %71 : vector<16x128xf32>
    %c0_41 = arith.constant 0 : index
    %c0_42 = arith.constant 0 : index
    %73 = vector.load %arg3[%c0_41, %c0_42] : memref<16x128xf32, #tpu.memory_space<vmem>>, vector<16x128xf32>
    tpu.vector_store %arg3[%c0_41, %c0_42], %72 {strides = array<i32>} : memref<16x128xf32, #tpu.memory_space<vmem>>, vector<16x128xf32>,
    return
  }
  func.func @transform_0(%arg0: i32) -> (i32, i32) {
    %c0_i32 = arith.constant 0 : i32
    %c0_i32_0 = arith.constant 0 : i32
    return %arg0, %c0_i32 : i32, i32
  }
  func.func @transform_1(%arg0: i32) -> (i32, i32, i32) {
    %c0_i32 = arith.constant 0 : i32
    %c0_i32_0 = arith.constant 0 : i32
    %c0_i32_1 = arith.constant 0 : i32
    %c0_i32_2 = arith.constant 0 : i32
    return %c0_i32, %c0_i32_0, %c0_i32_1 : i32, i32, i32
  }
  func.func @transform_2(%arg0: i32) -> (i32, i32) {
    %c0_i32 = arith.constant 0 : i32
    %c0_i32_0 = arith.constant 0 : i32
    return %arg0, %c0_i32 : i32, i32
  }
}

</mosaic_0001>

<bundles_post_ra>
// kernel: tpu_custom_call.1
= control target key start
LH: loop header
LB: loop body
LE: loop exit
PB: predicated region body
PF: predicated region fallthrough
CT: control target
= control target key end

     0   :  { %7 = vsyncpa [#allocation3], 0  ;;  %s907_s0 = inlined_call_operand.hbm [shape: bf16[16,128], index: 0, kind: input, shape index: {}]   ;;  %s908_s1 = inlined_call_operand.hbm [shape: bf16[5,144,128], index: 1, kind: input, shape index: {}]   ;;  %s909_s2 = inlined_call_operand.hbm [shape: f32[16,128], index: 2, kind: output, shape index: {}]  }
   0x1   :  { %8 = vsyncpa [#allocation6], 0 }
   0x2   :  { %9 = vsyncpa [#allocation4], 0  ;;  %s14_s11 = sshll.u32 %s907_s0, 4  ;;  %s876_s12 = smov [#allocation2]   ;;  %s15_s11 = int_to_ptr.hbm [resolvable:$true] %s14_s11 }
   0x3   :  { %s16_s13 = sshll.u32 %s876_s12, 4  ;;  %s27_s16 = sshll.u32 %s908_s1, 4  ;;  %s17_s13 = int_to_ptr.vmem [resolvable:$true] %s16_s13  ;;  %s28_s16 = int_to_ptr.hbm [resolvable:$true] %s27_s16 }
   0x4   :  { %s877_s17 = smov 64   ;;  %s878_s18 = smov 4  }
   0x5   :  { %22 = dma.hbm_to_vmem [thread:$0]  %s15_s11, 128, %s17_s13, [#allocation3], %s877_s17, %s877_s17, %s878_s18  }
   0x6   :  { %s879_s19 = smov [#allocation5]  }
   0x7   :  { %s29_s20 = sshll.u32 %s879_s19, 4  ;;  %s30_s20 = int_to_ptr.vmem [resolvable:$true] %s29_s20 }
   0x8   :  { %35 = dma.hbm_to_vmem [thread:$0]  %s28_s16, 5760, %s30_s20, [#allocation6], %s877_s17, %s877_s17, %s878_s18  }
   0x9   :  { %870 = dma.done.wait [#allocation3], 128  }
   0xa   :  { %871 = vsyncadd [#allocation3], 4294967168 }
   0xb   :  { %872 = dma.done.wait [#allocation6], 5760  }
   0xc   :  { %873 = vsyncadd [#allocation6], 4294961536  ;;  %v725_v0 = vld [vmem:[#allocation5 + $0x38] sm:$0xff]  ;;  %v724_v1 = vld [vmem:[#allocation5 + $0x30] sm:$0xff]  ;;  %s880_s0 = smov [#allocation7]   ;;  %s539_s23 = sshll.u32 %s909_s2, 4  ;;  %s540_s23 = int_to_ptr.hbm [resolvable:$true] %s539_s23 }
   0xd   :  { %127 = vmatpush.bf16.msra.mxu0 %v725_v0  ;;  %v733_v2 = vld [vmem:[#allocation5 + $0x80] sm:$0xff]  ;;  %v732_v3 = vld [vmem:[#allocation5 + $0x78] sm:$0xff]  ;;  %v723_v4 = vld [vmem:[#allocation5 + $0x28] sm:$0xff]  ;;  %s537_s1 = sshll.u32 %s880_s0, 4  ;;  %s881_s24 = smov 128   ;;  %s538_s1 = int_to_ptr.vmem [resolvable:$true] %s537_s1 }
   0xe   :  { %220 = vmatpush.bf16.msra.mxu1 %v733_v2  ;;  %v731_v5 = vld [vmem:[#allocation5 + $0x70] sm:$0xff]  ;;  %v722_v6 = vld [vmem:[#allocation5 + $0x20] sm:$0xff]  ;;  %v730_v7 = vld [vmem:[#allocation5 + $0x68] sm:$0xff]  ;;  %s882_s25 = smov 8  }
   0xf   :  { %v721_v8 = vld [vmem:[#allocation5 + $0x18] sm:$0xff]  ;;  %v720_v9 = vld [vmem:[#allocation5 + $0x10] sm:$0xff]  ;;  %v719_v10 = vld [vmem:[#allocation5 + $0x8] sm:$0xff] }
  0x10   :  { %v718_v11 = vld [vmem:[#allocation5] sm:$0xff]  ;;  %v717_v12 = vld [vmem:[#allocation2] sm:$0xff]  ;;  %v727_v16 = vld [vmem:[#allocation5 + $0x50] sm:$0xff] }
  0x11   :  { %128 = vmatpush.bf16.msra.mxu0 %v724_v1  ;;  %v729_v13 = vld [vmem:[#allocation5 + $0x60] sm:$0xff]  ;;  %v728_v14 = vld [vmem:[#allocation5 + $0x58] sm:$0xff]  ;;  %v726_v19 = vld [vmem:[#allocation5 + $0x48] sm:$0xff] }
  0x12   :  { %221 = vmatpush.bf16.msra.mxu1 %v732_v3  ;;  %v778_v15 = vld [vmem:[#allocation5 + $0x40] sm:$0xff]   ;;  %v741_v22 = vld [vmem:[#allocation5 + $0xc8] sm:$0xff]  ;;  %v739_v25 = vld [vmem:[#allocation5 + $0xb8] sm:$0xff] }
  0x13   :  { %v760_v17 = vunpack.c.l.bf16 %v778_v15  ;;  %v761_v18 = vunpack.c.h.bf16 %v778_v15  ;;  %313 = vmatpush.bf16.msra.mxu2 %v741_v22  ;;  %v740_v23 = vld [vmem:[#allocation5 + $0xc0] sm:$0xff]  ;;  %v738_v27 = vld [vmem:[#allocation5 + $0xb0] sm:$0xff]  ;;  %v737_v38 = vld [vmem:[#allocation5 + $0xa8] sm:$0xff] }
  0x14   :  { %v736_v39 = vld [vmem:[#allocation5 + $0xa0] sm:$0xff]  ;;  %v779_v40 = vld [vmem:[#allocation5 + $0x88] sm:$0xff]   ;;  %v735_v41 = vld [vmem:[#allocation5 + $0x98] sm:$0xff] }
  0x15   :  { %129 = vmatpush.bf16.msra.mxu0 %v723_v4  ;;  %v66_v20 = vadd.f32 %v761_v18, %v760_v17  ;;  %v764_v42 = vunpack.c.l.bf16 %v779_v40  ;;  %v765_v43 = vunpack.c.h.bf16 %v779_v40  ;;  %v734_v44 = vld [vmem:[#allocation5 + $0x90] sm:$0xff]  ;;  %v748_v48 = vld [vmem:[#allocation5 + $0x108] sm:$0xff]  ;;  %v747_v50 = vld [vmem:[#allocation5 + $0x100] sm:$0xff] }
  0x16   :  { %222 = vmatpush.bf16.msra.mxu1 %v731_v5  ;;  %v749_v47 = vld [vmem:[#allocation5 + $0x110] sm:$0xff]  ;;  %v746_v52 = vld [vmem:[#allocation5 + $0xf8] sm:$0xff]  ;;  %v744_v0 = vld [vmem:[#allocation5 + $0xe8] sm:$0xff] }
  0x17   :  { %v67_v21 = vrot.slane %v66_v20, 4  ;;  %314 = vmatpush.bf16.msra.mxu2 %v740_v23  ;;  %v165_v45 = vadd.f32 %v765_v43, %v764_v42  ;;  %406 = vmatpush.bf16.msra.mxu3 %v749_v47  ;;  %v745_v63 = vld [vmem:[#allocation5 + $0xf0] sm:$0xff]  ;;  %v743_v2 = vld [vmem:[#allocation5 + $0xe0] sm:$0xff]  ;;  %v742_v5 = vld [vmem:[#allocation5 + $0xd8] sm:$0xff] }
  0x18   :  { %v780_v1 = vld [vmem:[#allocation5 + $0xd0] sm:$0xff]  }
  0x19   :  { %130 = vmatpush.bf16.msra.mxu0 %v722_v6  ;;  %v68_v24 = vadd.f32 %v67_v21, %v66_v20  ;;  %v166_v46 = vrot.slane %v165_v45, 4  ;;  %v768_v3 = vunpack.c.l.bf16 %v780_v1  ;;  %v769_v4 = vunpack.c.h.bf16 %v780_v1 }
  0x1a   :  { %223 = vmatpush.bf16.msra.mxu1 %v730_v7 }
  0x1b   :  { %v69_v26 = vrot.slane %v68_v24, 2  ;;  %315 = vmatpush.bf16.msra.mxu2 %v739_v25  ;;  %v167_v49 = vadd.f32 %v166_v46, %v165_v45  ;;  %407 = vmatpush.bf16.msra.mxu3 %v748_v48  ;;  %v258_v6 = vadd.f32 %v769_v4, %v768_v3  ;;  %v752_v25 = vld [vmem:[#allocation5 + $0x130] sm:$0xff]  ;;  %v782_v45 = vld [vmem:[#allocation5 + $0x160] sm:$0xff]  }
  0x1c   :  { %v776_v46 = vunpack.c.l.bf16 %v782_v45  ;;  %v777_v47 = vunpack.c.h.bf16 %v782_v45 }
  0x1d   :  { %131 = vmatpush.bf16.msra.mxu0 %v721_v8  ;;  %v70_v28 = vadd.f32 %v69_v26, %v68_v24  ;;  %v168_v51 = vrot.slane %v167_v49, 2  ;;  %v259_v7 = vrot.slane %v258_v6, 4  ;;  %v757_v8 = vld [vmem:[#allocation5 + $0x158] sm:$0xff] }
  0x1e   :  { %224 = vmatpush.bf16.msra.mxu1 %v729_v13  ;;  %v754_v13 = vld [vmem:[#allocation5 + $0x140] sm:$0xff]  ;;  %v753_v24 = vld [vmem:[#allocation5 + $0x138] sm:$0xff]  ;;  %v444_v48 = vadd.f32 %v777_v47, %v776_v46 }
  0x1f   :  { %316 = vmatpush.bf16.msra.mxu2 %v738_v27  ;;  %v71_v29 = vrot.slane %v70_v28, 1  ;;  %408 = vmatpush.bf16.msra.mxu3 %v747_v50  ;;  %v169_v53 = vadd.f32 %v168_v51, %v167_v49  ;;  %v781_v26 = vld [vmem:[#allocation5 + $0x118] sm:$0xff]   ;;  %v751_v27 = vld [vmem:[#allocation5 + $0x128] sm:$0xff] }
  0x20   :  { %v445_v49 = vrot.slane %v444_v48, 4 }
  0x21   :  { %132 = vmatpush.bf16.msra.mxu0 %v720_v9  ;;  %v72_v31 = vadd.f32 %v71_v29, %v70_v28  ;;  %v170_v54 = vrot.slane %v169_v53, 1  ;;  %v756_v9 = vld [vmem:[#allocation5 + $0x150] sm:$0xff]  ;;  %v772_v28 = vunpack.c.l.bf16 %v781_v26  ;;  %v773_v29 = vunpack.c.h.bf16 %v781_v26 }
  0x22   :  { %225 = vmatpush.bf16.msra.mxu1 %v728_v14  ;;  %v446_v50 = vadd.f32 %v445_v49, %v444_v48 }
  0x23   :  { %317 = vmatpush.bf16.msra.mxu2 %v737_v38  ;;  %409 = vmatpush.bf16.msra.mxu3 %v746_v52  ;;  %v171_v56 = vadd.f32 %v170_v54, %v169_v53 }
  0x24   :  { %v447_v51 = vrot.slane %v446_v50, 2 }
  0x25   :  { %133 = vmatpush.bf16.msra.mxu0 %v719_v10  ;;  %v260_v10 = vadd.f32 %v259_v7, %v258_v6 }
  0x26   :  { %226 = vmatpush.bf16.msra.mxu1 %v727_v16  ;;  %v448_v52 = vadd.f32 %v447_v51, %v446_v50 }
  0x27   :  { %318 = vmatpush.bf16.msra.mxu2 %v736_v39  ;;  %410 = vmatpush.bf16.msra.mxu3 %v745_v63 }
  0x28   :  { %v449_v53 = vrot.slane %v448_v52, 1 }
  0x29   :  { %134 = vmatpush.bf16.msra.mxu0 %v718_v11  ;;  %v755_v11 = vld [vmem:[#allocation5 + $0x148] sm:$0xff] }
  0x2a   :  { %227 = vmatpush.bf16.msra.mxu1 %v726_v19  ;;  %v450_v54 = vadd.f32 %v449_v53, %v448_v52 }
  0x2b   :  { %319 = vmatpush.bf16.msra.mxu2 %v735_v41  ;;  %411 = vmatpush.bf16.msra.mxu3 %v744_v0 }
  0x2c   :  { %135 = vmatmul.bf16.vlgmr.msra.gmra.mxu0 %v717_v12  ;;  %v261_v12 = vrot.slane %v260_v10, 2 }
  0x2d   :  { %499 = vmatpush.bf16.msrb.mxu0 %v757_v8 }
  0x2e   :  { %v262_v14 = vadd.f32 %v261_v12, %v260_v10 }
  0x2f   :  { %320 = vmatpush.bf16.msra.mxu2 %v734_v44  ;;  %412 = vmatpush.bf16.msra.mxu3 %v743_v2 }
  0x30   :  { %v263_v15 = vrot.slane %v262_v14, 1 }
  0x31   :  { %500 = vmatpush.bf16.msrb.mxu0 %v756_v9 }
  0x32   :  { %v264_v17 = vadd.f32 %v263_v15, %v262_v14 }
  0x33   :  { %413 = vmatpush.bf16.msra.mxu3 %v742_v5 }
  0x35   :  { %501 = vmatpush.bf16.msrb.mxu0 %v755_v11 }
  0x39   :  { %502 = vmatpush.bf16.msrb.mxu0 %v754_v13 }
  0x3d   :  { %503 = vmatpush.bf16.msrb.mxu0 %v753_v24 }
  0x41   :  { %504 = vmatpush.bf16.msrb.mxu0 %v752_v25 }
  0x45   :  { %505 = vmatpush.bf16.msrb.mxu0 %v751_v27 }
  0xa9   :  { %v136_v30 = vpop.f32.mrf.mxu0 }
  0xaa   :  { %v137_v32 = vadd.f32 %v136_v30, %v72_v31  ;;  %v750_v30 = vld [vmem:[#allocation5 + $0x120] sm:$0xff] }
  0xab   :  { %506 = vmatpush.bf16.msrb.mxu0 %v750_v30 }
  0xac   :  { %v141_v35 = vmax.f32 %v137_v32, 0.0 }
  0xb1   :  { %v138_v33 = vpop.f32.mrf.mxu0 }
  0xb2   :  { %v139_v34 = vadd.f32 %v138_v33, %v72_v31  ;;  %v351_v31 = vadd.f32 %v773_v29, %v772_v28 }
  0xb4   :  { %v142_v36 = vmax.f32 %v139_v34, 0.0  ;;  %v352_v32 = vrot.slane %v351_v31, 4 }
  0xb6   :  { %v143_v37 = vpack.c.bf16 %v142_v36, %v141_v35  ;;  %v353_v33 = vadd.f32 %v352_v32, %v351_v31 }
  0xb8   :  { %228 = vmatmul.bf16.vlgmr.msra.gmra.mxu1 %v143_v37  ;;  %v354_v34 = vrot.slane %v353_v33, 2 }
  0xba   :  { %v355_v35 = vadd.f32 %v354_v34, %v353_v33 }
  0xbc   :  { %v356_v36 = vrot.slane %v355_v35, 1 }
  0xbe   :  { %v357_v38 = vadd.f32 %v356_v36, %v355_v35 }
 0x135   :  { %v229_v55 = vpop.f32.mrf.mxu1 }
 0x136   :  { %v230_v57 = vadd.f32 %v229_v55, %v171_v56 }
 0x138   :  { %v234_v60 = vmax.f32 %v230_v57, 0.0 }
 0x13d   :  { %v231_v58 = vpop.f32.mrf.mxu1 }
 0x13e   :  { %v232_v59 = vadd.f32 %v231_v58, %v171_v56 }
 0x140   :  { %v235_v61 = vmax.f32 %v232_v59, 0.0 }
 0x142   :  { %v236_v62 = vpack.c.bf16 %v235_v61, %v234_v60 }
 0x144   :  { %321 = vmatmul.bf16.vlgmr.msra.gmra.mxu2 %v236_v62 }
 0x1c7   :  { %v322_v16 = vpop.f32.mrf.mxu2 }
 0x1c8   :  { %v323_v18 = vadd.f32 %v322_v16, %v264_v17 }
 0x1ca   :  { %v327_v21 = vmax.f32 %v323_v18, 0.0 }
 0x1cf   :  { %v324_v19 = vpop.f32.mrf.mxu2 }
 0x1d0   :  { %v325_v20 = vadd.f32 %v324_v19, %v264_v17 }
 0x1d2   :  { %v328_v22 = vmax.f32 %v325_v20, 0.0 }
 0x1d4   :  { %v329_v23 = vpack.c.bf16 %v328_v22, %v327_v21 }
 0x1d6   :  { %414 = vmatmul.bf16.vlgmr.msra.gmra.mxu3 %v329_v23 }
 0x259   :  { %v415_v37 = vpop.f32.mrf.mxu3 }
 0x25a   :  { %v416_v39 = vadd.f32 %v415_v37, %v357_v38 }
 0x25c   :  { %v420_v42 = vmax.f32 %v416_v39, 0.0 }
 0x261   :  { %v417_v40 = vpop.f32.mrf.mxu3 }
 0x262   :  { %v418_v41 = vadd.f32 %v417_v40, %v357_v38 }
 0x264   :  { %v421_v43 = vmax.f32 %v418_v41, 0.0 }
 0x266   :  { %v422_v44 = vpack.c.bf16 %v421_v43, %v420_v42 }
 0x268   :  { %507 = vmatmul.bf16.vlgmr.msrb.gmra.mxu0 %v422_v44 }
 0x2e5   :  { %v508_v55 = vpop.f32.mrf.mxu0 }
 0x2e6   :  { %v509_v56 = vadd.f32 %v508_v55, %v450_v54 }
 0x2e8   :  { %513 = vmax.xlane.f32.xlu0 %v509_v56 }
 0x2ed   :  { %v510_v57 = vpop.f32.mrf.mxu0 }
 0x2ee   :  { %v511_v58 = vadd.f32 %v510_v57, %v450_v54 }
 0x2f0   :  { %515 = vmax.xlane.f32.xlu0 %v511_v58 }
 0x35b   :  { %v514_v59 = vpop.xlane.xlu0 %513 }
 0x35c   :  { %v517_v60 = vsub.f32 %v509_v56, %v514_v59 }
 0x35e   :  { %v519_v61 = vmul.f32 1.442695, %v517_v60 }
 0x360   :  { %790 = vpow2.f32 %v519_v61 }
 0x363   :  { %v516_v62 = vpop.xlane.xlu0 %515 }
 0x364   :  { %v518_v63 = vsub.f32 %v511_v58, %v516_v62 }
 0x366   :  { %v791_v0 = vpop.eup %790  ;;  %v521_v1 = vmul.f32 1.442695, %v518_v63 }
 0x367   :  { %523 = vadd.xlane.f32.xlu1 %v791_v0 }
 0x368   :  { %792 = vpow2.f32 %v521_v1 }
 0x36e   :  { %v793_v2 = vpop.eup %792 }
 0x36f   :  { %525 = vadd.xlane.f32.xlu1 %v793_v2 }
 0x3da   :  { %v524_v3 = vpop.xlane.xlu1 %523 }
 0x3db   :  { %794 = vrcp.f32 %v524_v3 }
 0x3e1   :  { %v795_v4 = vpop.eup %794 }
 0x3e2   :  { %v529_v5 = vmul.f32 %v795_v4, %v791_v0  ;;  %v526_v6 = vpop.xlane.xlu1 %525 }
 0x3e3   :  { %796 = vrcp.f32 %v526_v6 }
 0x3e4   :  { %531 = vst [vmem:[#allocation7] sm:$0xff] %v529_v5 }
 0x3e9   :  { %v797_v7 = vpop.eup %796 }
 0x3ea   :  { %v530_v8 = vmul.f32 %v797_v7, %v793_v2 }
 0x3ec   :  { %532 = vst [vmem:[#allocation7 + $0x8] sm:$0xff] %v530_v8 }
 0x3ed   :  { %545 = dma.vmem_to_hbm [thread:$0]  %s538_s1, 256, %s540_s23, [#allocation4], %s881_s24, %s881_s24, %s882_s25  }
 0x3ee   :  { %874 = dma.done.wait [#allocation4], 256  }
 0x3ef   :  { %875 = vsyncadd [#allocation4], 4294967040 }
 0x3f0   :  { %550 = vsyncpa [#allocation3], 1 }
 0x3f1   :  { %551 = vsyncpa [#allocation6], 1 }
 0x3f2   :  { %552 = vsyncpa [#allocation4], 1 }

</bundles_post_ra>
